<compile_context>
chip_gen: v7x
topology: tpu7x:2x2x1
jax: 0.10.0
libtpu: 0.0.40
codegen_flags: <defaults>
</compile_context>

<pallas_src>
import numpy as np

import jax
import jax.numpy as jnp
from jax.experimental import pallas as pl
from jax.experimental.pallas import tpu as pltpu


def _adaptive_windows(in_size: int, out_size: int):
    """PyTorch adaptive pooling window boundaries (static Python ints)."""
    bounds = []
    for i in range(out_size):
        start = (i * in_size) // out_size
        end = -((-(i + 1) * in_size) // out_size)  # ceil((i+1)*in/out)
        bounds.append((start, end))
    return bounds


def _pool_matrix(H: int, W: int, oh: int, ow: int) -> np.ndarray:
    """Static averaging matrix P: (H*W, oh*ow); column (i,j) = 1/area on its window."""
    P = np.zeros((H * W, oh * ow), dtype=np.float32)
    for i, (h0, h1) in enumerate(_adaptive_windows(H, oh)):
        for j, (w0, w1) in enumerate(_adaptive_windows(W, ow)):
            inv = 1.0 / float((h1 - h0) * (w1 - w0))
            col = i * ow + j
            for h in range(h0, h1):
                P[h * W + w0:h * W + w1, col] = inv
    return P


def _round_up(x: int, m: int) -> int:
    return ((x + m - 1) // m) * m


# --------------------------------------------------------------------------
# Kernels
# --------------------------------------------------------------------------
def _pool_kernel(x_ref, p_ref, o_ref):
    # x_ref: (tn, HW), p_ref: (HW, OHW), o_ref: (tn, OHW)
    o_ref[...] = jnp.dot(
        x_ref[...],
        p_ref[...],
        preferred_element_type=jnp.float32,
        precision=jax.lax.Precision.HIGHEST,
    ).astype(o_ref.dtype)


def _pool_kernel_ktiled(x_ref, p_ref, o_ref, acc_ref):
    # x_ref: (tn, tk), p_ref: (tk, OHW), o_ref/acc_ref: (tn, OHW)
    k = pl.program_id(1)

    @pl.when(k == 0)
    def _():
        acc_ref[...] = jnp.zeros_like(acc_ref)

    acc_ref[...] += jnp.dot(
        x_ref[...],
        p_ref[...],
        preferred_element_type=jnp.float32,
        precision=jax.lax.Precision.HIGHEST,
    )

    @pl.when(k == pl.num_programs(1) - 1)
    def _():
        o_ref[...] = acc_ref[...].astype(o_ref.dtype)


# --------------------------------------------------------------------------
# Tiling helpers
# --------------------------------------------------------------------------
def _vmem_capacity_bytes() -> int:
    """Physical VMEM capacity; falls back to the smallest generation (v7x)."""
    try:
        cap = int(getattr(pltpu.get_tpu_info(), "vmem_capacity_bytes"))
        if cap > 0:
            return cap
    except Exception:
        pass
    return 64 * 1024 * 1024


def _choose_tn(N: int, tn_cap: int) -> int:
    """Sublane tile: big as fits, but >= 2 grid steps and an even step count
    so the 'parallel' axis splits evenly across two TensorCores (v7x)."""
    tn = max(8, min(tn_cap, _round_up(N, 8)))
    if N >= 16:
        steps = pl.cdiv(N, tn)
        if steps < 2:
            tn = _round_up(pl.cdiv(N, 2), 8)
        elif steps % 2 == 1:
            tn = _round_up(pl.cdiv(N, steps + 1), 8)
    return max(8, tn)


def _largest_tk(HW: int, cap: int) -> int:
    """Largest multiple-of-128 divisor of HW that is <= cap (0 if none)."""
    best, t = 0, 128
    while t <= cap:
        if HW % t == 0:
            best = t
        t += 128
    return best


# --------------------------------------------------------------------------
# Wrapper
# --------------------------------------------------------------------------
def adaptive_avg_pool2d_equivariant(x, output_size, *,
                                    _force_k_path: bool = False,
                                    _max_tk: int = 2048):
    """x: (B, C, G, H, W). Returns (B, C, G, oh, ow)."""
    if isinstance(output_size, int):
        oh, ow = output_size, output_size
    else:
        oh, ow = output_size

    B, C, G, H, W = x.shape
    N = B * C * G
    HW = H * W
    OHW = oh * ow

    x_flat = x.reshape(N, HW)          # contiguous view, no data movement
    p = jnp.asarray(_pool_matrix(H, W, oh, ow))

    in_b = x.dtype.itemsize
    out_b = in_b

    # Generation-aware VMEM budget (v5e/v6e 128 MiB -> 48 MiB; v7x 64 -> 32).
    vmem_cap = _vmem_capacity_bytes()
    budget = max(12 * 2**20, min(vmem_cap // 2, 48 * 2**20))

    # Hardware-padded footprints: lane dim pads to 128, sublane to 8.
    ohw_lanes = _round_up(OHW, 128)
    p_buf = 2 * _round_up(HW, 8) * ohw_lanes * 4                 # resident P, dbl-buffered
    per_row = 2 * _round_up(HW, 128) * in_b + 2 * ohw_lanes * out_b

    tk = _largest_tk(HW, min(_max_tk, HW))
    use_k = tk > 0 and (
        _force_k_path
        or p_buf > budget // 4            # P too big to keep fully resident
        or budget - p_buf < 8 * per_row   # not even a minimal x tile would fit
    )

    cost = pl.CostEstimate(
        flops=2 * N * HW * OHW,
        transcendentals=0,
        bytes_accessed=N * HW * in_b + N * OHW * out_b + HW * OHW * 4,
    )

    if not use_k:
        # Whole-HW path: one MXU dot per N-tile, P resident across the grid.
        if budget > p_buf:
            tn_cap = max(8, min(8192, ((budget - p_buf) // per_row) // 8 * 8))
        else:
            tn_cap = 8  # TODO(synk): huge HW with no mult-of-128 divisor; rare.
        tn = _choose_tn(N, tn_cap)
        grid = (pl.cdiv(N, tn),)
        footprint = tn * per_row + p_buf
        vmem_limit = int(min(vmem_cap, max(32 * 2**20, footprint + 4 * 2**20)))

        out = pl.pallas_call(
            _pool_kernel,
            out_shape=jax.ShapeDtypeStruct((N, OHW), x.dtype),
            grid_spec=pltpu.PrefetchScalarGridSpec(
                num_scalar_prefetch=0,
                grid=grid,
                in_specs=[
                    pl.BlockSpec((tn, HW), lambda n: (n, 0)),    # x rows tile
                    pl.BlockSpec((HW, OHW), lambda n: (0, 0)),   # P, fetched once
                ],
                out_specs=pl.BlockSpec((tn, OHW), lambda n: (n, 0)),
            ),
            compiler_params=pltpu.CompilerParams(
                dimension_semantics=("parallel",),
                vmem_limit_bytes=vmem_limit,
            ),
            cost_estimate=cost,
        )(x_flat, p)
    else:
        # K-tiled path for large HW: accumulate over HW chunks in f32 scratch.
        p_buf_k = 2 * tk * ohw_lanes * 4
        per_row_k = 2 * tk * in_b + 2 * ohw_lanes * out_b + ohw_lanes * 4
        tn_cap = max(8, min(8192, ((budget - p_buf_k) // per_row_k) // 8 * 8))
        tn = _choose_tn(N, tn_cap)
        grid = (pl.cdiv(N, tn), HW // tk)
        footprint = tn * per_row_k + p_buf_k
        vmem_limit = int(min(vmem_cap, max(32 * 2**20, footprint + 4 * 2**20)))

        out = pl.pallas_call(
            _pool_kernel_ktiled,
            out_shape=jax.ShapeDtypeStruct((N, OHW), x.dtype),
            grid_spec=pltpu.PrefetchScalarGridSpec(
                num_scalar_prefetch=0,
                grid=grid,
                in_specs=[
                    pl.BlockSpec((tn, tk), lambda n, k: (n, k)),
                    pl.BlockSpec((tk, OHW), lambda n, k: (k, 0)),
                ],
                out_specs=pl.BlockSpec((tn, OHW), lambda n, k: (n, 0)),
                scratch_shapes=[pltpu.VMEM((tn, OHW), jnp.float32)],
            ),
            compiler_params=pltpu.CompilerParams(
                dimension_semantics=("parallel", "arbitrary"),
                vmem_limit_bytes=vmem_limit,
            ),
            cost_estimate=cost,
        )(x_flat, p)

    return out.reshape(B, C, G, oh, ow)


# --------------------------------------------------------------------------
# Pure-JAX reference (PyTorch adaptive avg pool formula)
# --------------------------------------------------------------------------
def _reference(x, output_size):
    if isinstance(output_size, int):
        oh, ow = output_size, output_size
    else:
        oh, ow = output_size
    B, C, G, H, W = x.shape
    xf = x.reshape(B * C * G, H, W).astype(jnp.float32)
    rows = []
    for (h0, h1) in _adaptive_windows(H, oh):
        cols = []
        for (w0, w1) in _adaptive_windows(W, ow):
            cols.append(jnp.mean(xf[:, h0:h1, w0:w1], axis=(1, 2)))
        rows.append(jnp.stack(cols, axis=-1))
    out = jnp.stack(rows, axis=-2)  # (N, oh, ow)
    return out.reshape(B, C, G, oh, ow).astype(x.dtype)


if __name__ == "__main__":
    key = jax.random.PRNGKey(0)
    B, C, G, H, W = 2, 4, 4, 16, 16
    x = jax.random.normal(key, (B, C, G, H, W), dtype=jnp.float32)

    output_size = (3, 5)  # non-divisible -> general adaptive windows
    y = jax.block_until_ready(adaptive_avg_pool2d_equivariant(x, output_size))
    y_ref = _reference(x, output_size)
    assert y.shape == (B, C, G, 3, 5), y.shape
    assert jnp.allclose(y, y_ref, atol=1e-5, rtol=1e-5), "mismatch vs reference"

    # Common global-pool case (1, 1).
    y1 = jax.block_until_ready(adaptive_avg_pool2d_equivariant(x, 1))
    assert jnp.allclose(y1, _reference(x, 1), atol=1e-5, rtol=1e-5)

    # N not a multiple of 8 / of the tile — exercises the masked partial
    # last block (no host-side padding anymore).
    x2 = jax.random.normal(key, (1, 3, 4, 16, 16), dtype=jnp.float32)
    y2 = jax.block_until_ready(adaptive_avg_pool2d_equivariant(x2, (3, 5)))
    assert jnp.allclose(y2, _reference(x2, (3, 5)), atol=1e-5, rtol=1e-5)

    # Large-spatial (K-tiled accumulation) path, forced at a small shape so it
    # is exercised here: HW=256 split into two 128-wide K blocks.
    y3 = jax.block_until_ready(
        adaptive_avg_pool2d_equivariant(x, (3, 5), _force_k_path=True, _max_tk=128))
    assert jnp.allclose(y3, y_ref, atol=1e-5, rtol=1e-5)

    print("KERNEL_OK")
</pallas_src>

<mosaic_0001>
module attributes {stable_mosaic.version = 11 : i64} {
  func.func @_pool_kernel(%arg0: i32, %arg1: memref<16x256xf32, #tpu.memory_space<vmem>>, %arg2: memref<256x15xf32, #tpu.memory_space<vmem>>, %arg3: memref<16x15xf32, #tpu.memory_space<vmem>>) attributes {dimension_semantics = [#tpu.dimension_semantics<parallel>], iteration_bounds = array<i64: 2>, scalar_prefetch = 0 : i64, scratch_operands = 0 : i64, tpu.core_type = #tpu.core_type<tc>, window_params = [{transform_indices = @transform_0, window_bounds = array<i64: 16, 256>}, {pipeline_mode = #tpu.pipeline_mode<synchronous>, transform_indices = @transform_1, window_bounds = array<i64: 256, 15>}, {transform_indices = @transform_2, window_bounds = array<i64: 16, 15>}]} {
    %c0 = arith.constant 0 : index
    %c0_0 = arith.constant 0 : index
    %0 = vector.load %arg1[%c0, %c0_0] : memref<16x256xf32, #tpu.memory_space<vmem>>, vector<16x256xf32>
    %c0_1 = arith.constant 0 : index
    %c0_2 = arith.constant 0 : index
    %1 = vector.load %arg2[%c0_1, %c0_2] : memref<256x15xf32, #tpu.memory_space<vmem>>, vector<256x15xf32>
    %cst = arith.constant dense<0.000000e+00> : vector<16x15xf32>
    %2 = tpu.matmul %0, %1, %cst {dimension_numbers = #tpu.dot_dimension_numbers<[1], [0], [0], [1], [0, 0, 1, 1], [], []>, precision = #tpu.contract_precision<fp32>} : vector<16x256xf32>, vector<256x15xf32>, vector<16x15xf32> -> vector<16x15xf32>
    %c0_3 = arith.constant 0 : index
    %c0_4 = arith.constant 0 : index
    %3 = vector.load %arg3[%c0_3, %c0_4] : memref<16x15xf32, #tpu.memory_space<vmem>>, vector<16x15xf32>
    tpu.vector_store %arg3[%c0_3, %c0_4], %2 {strides = array<i32>} : memref<16x15xf32, #tpu.memory_space<vmem>>, vector<16x15xf32>,
    return
  }
  func.func @transform_0(%arg0: i32) -> (i32, i32) {
    %c0_i32 = arith.constant 0 : i32
    %c0_i32_0 = arith.constant 0 : i32
    return %arg0, %c0_i32 : i32, i32
  }
  func.func @transform_1(%arg0: i32) -> (i32, i32) {
    %c0_i32 = arith.constant 0 : i32
    %c0_i32_0 = arith.constant 0 : i32
    %c0_i32_1 = arith.constant 0 : i32
    return %c0_i32, %c0_i32_0 : i32, i32
  }
  func.func @transform_2(%arg0: i32) -> (i32, i32) {
    %c0_i32 = arith.constant 0 : i32
    %c0_i32_0 = arith.constant 0 : i32
    return %arg0, %c0_i32 : i32, i32
  }
}

</mosaic_0001>

<bundles_post_ra>
// kernel: tpu_custom_call.1
= control target key start
LH: loop header
LB: loop body
LE: loop exit
PB: predicated region body
PF: predicated region fallthrough
CT: control target
= control target key end

     0   :  { %s1627_s9 = smov 0   ;;  %s2198_s0 = inlined_call_operand.vmem [shape: f32[32,256], index: 0, kind: input, shape index: {}]   ;;  %s2199_s1 = inlined_call_operand.vmem [shape: f32[256,15], index: 1, kind: input, shape index: {}]   ;;  %s2200_s2 = inlined_call_operand.vmem [shape: f32[32,15], index: 2, kind: output, shape index: {}]  }
   0x1 LB: > { %s1163_s10 = sadd.s32 4294967295, %s1610_s9   ;;  %p1167_p0 = scmp.ge.s32.totalorder %s1610_s9, 1  ;;  %s1610_s9 = sphi %s1627_s9, %s12_s9  }
   0x2   : > { %p114_p1 = scmp.lt.s32.totalorder %s1610_s9, 3 }
   0x4   : > { %p115_p2 = pnand %p1167_p0, %p114_p1 }
   0x6   : > { %118 = sbr.rel (%p115_p2) target bundleno = 360 (0x168), region = 28 }
   0xd   : > { %v170_v0 = vld [vmem:[%s2199_s1 + $0x80] sm:$0xff]  ;;  %v171_v1 = vld [vmem:[%s2199_s1 + $0x88] sm:$0xff]  ;;  %v172_v7 = vld [vmem:[%s2199_s1 + $0x90] sm:$0xff]  ;;  %s1811_s3 = sshll.u32 %s1163_s10, 1  ;;  %vm1104_vm0 = vcmask 121856  }
   0xe   : > { %v154_v2 = vld [vmem:[%s2199_s1] sm:$0xff]  ;;  %v235_v3 = vand.u32 4294901760, %v170_v0  ;;  %v238_v4 = vand.u32 4294901760, %v171_v1  ;;  %v155_v5 = vld [vmem:[%s2199_s1 + $0x8] sm:$0xff]  ;;  %v173_v8 = vld [vmem:[%s2199_s1 + $0x98] sm:$0xff]  ;;  %v241_v10 = vand.u32 4294901760, %v172_v7 }
   0xf   : > { %v187_v6 = vand.u32 4294901760, %v154_v2  ;;  %v190_v9 = vand.u32 4294901760, %v155_v5  ;;  %v244_v11 = vand.u32 4294901760, %v173_v8  ;;  %v156_v12 = vld [vmem:[%s2199_s1 + $0x10] sm:$0xff]  ;;  %v157_v13 = vld [vmem:[%s2199_s1 + $0x18] sm:$0xff]  ;;  %v174_v18 = vld [vmem:[%s2199_s1 + $0xa0] sm:$0xff] }
  0x10   : > { %v1659_v14 = vpack.c.bf16 %v238_v4, %v235_v3  ;;  %v193_v16 = vand.u32 4294901760, %v156_v12  ;;  %v196_v17 = vand.u32 4294901760, %v157_v13  ;;  %v175_v19 = vld [vmem:[%s2199_s1 + $0xa8] sm:$0xff]  ;;  %v158_v23 = vld [vmem:[%s2199_s1 + $0x20] sm:$0xff]  ;;  %v1682_v25 = vsub.f32 %v172_v7, %v241_v10  ;;  %v176_v37 = vld [vmem:[%s2199_s1 + $0xb0] sm:$0xff]  ;;  %p138_p3 = scmp.lt.s32.totalorder %s1811_s3, 3 }
  0x11   : > { %v1661_v15 = vsub.f32 %v154_v2, %v187_v6  ;;  %v1669_v20 = vpack.c.bf16 %v190_v9, %v187_v6  ;;  %v1671_v21 = vsub.f32 %v155_v5, %v190_v9  ;;  %v1673_v22 = vpack.c.bf16 %v244_v11, %v241_v10  ;;  %v159_v24 = vld [vmem:[%s2199_s1 + $0x28] sm:$0xff]  ;;  %v177_v42 = vld [vmem:[%s2199_s1 + $0xb8] sm:$0xff]  ;;  %v160_v55 = vld [vmem:[%s2199_s1 + $0x30] sm:$0xff] }
  0x12   : > { %1405 = vmatprep.subr.bf16.mxu0 %v1659_v14  ;;  %v1684_v26 = vsub.f32 %v173_v8, %v244_v11  ;;  %v1686_v27 = vpack.c.bf16 %v196_v17, %v193_v16  ;;  %v1688_v28 = vsub.f32 %v156_v12, %v193_v16  ;;  %v247_v29 = vand.u32 4294901760, %v174_v18  ;;  %v161_v56 = vld [vmem:[%s2199_s1 + $0x38] sm:$0xff]  ;;  %v178_v5 = vld [vmem:[%s2199_s1 + $0xc0] sm:$0xff]  ;;  %v179_v6 = vld [vmem:[%s2199_s1 + $0xc8] sm:$0xff]  ;;  %s2302_s3 = smov (!%p138_p3, %s1811_s3), 3 }
  0x13   : > { %1407 = vmatpush3.bf16.msra.mxu0 %v1669_v20  ;;  %v250_v30 = vand.u32 4294901760, %v175_v19  ;;  %v1691_v31 = vsub.f32 %v170_v0, %v235_v3  ;;  %v1693_v32 = vsub.f32 %v171_v1, %v238_v4  ;;  %v199_v33 = vand.u32 4294901760, %v158_v23  ;;  %v162_v11 = vld [vmem:[%s2199_s1 + $0x40] sm:$0xff]  ;;  %s1175_s19 = sshll.u32 %s2302_s3, 4  ;;  %s1172_s27 = sshll.u32 %s2302_s3, 3 }
  0x14   : > { %1409 = vmatprep.subr.bf16.mxu0 %v1673_v22  ;;  %v202_v34 = vand.u32 4294901760, %v159_v24  ;;  %v2218_v35 = vand.u32 4294901760, %v1661_v15  ;;  %v2217_v36 = vand.u32 4294901760, %v1671_v21  ;;  %v1701_v38 = vsub.f32 %v157_v13, %v196_v17  ;;  %s1920_s26 = scalar_lea.vmem %s2198_s0, %s1175_s19  ;;  %s148_s30 = scalar_lea.vmem %s2200_s2, %s1172_s27 }
  0x15   : > { %v1703_v39 = vpack.c.bf16 %v250_v30, %v247_v29  ;;  %v1705_v40 = vsub.f32 %v174_v18, %v247_v29  ;;  %v2220_v41 = vand.u32 4294901760, %v1691_v31  ;;  %v1711_v43 = vsub.f32 %v175_v19, %v250_v30  ;;  %v163_v29 = vld [vmem:[%s2199_s1 + $0x48] sm:$0xff] }
  0x16   : > { %v2219_v44 = vand.u32 4294901760, %v1693_v32  ;;  %v1714_v45 = vpack.c.bf16 %v202_v34, %v199_v33  ;;  %v1716_v46 = vsub.f32 %v158_v23, %v199_v33  ;;  %v317_v48 = vsub.f32 %v1661_v15, %v2218_v35 }
  0x17   : > { %1411 = vmatpush3.bf16.msra.mxu0 %v1686_v27  ;;  %v429_v47 = vsub.f32 %v1691_v31, %v2220_v41  ;;  %v324_v49 = vsub.f32 %v1671_v21, %v2217_v36  ;;  %v253_v50 = vand.u32 4294901760, %v176_v37  ;;  %v256_v52 = vand.u32 4294901760, %v177_v42  ;;  %v151_v41 = vld [vmem:[%s1920_s26 + $0x8] sm:$0xff] }
  0x18   : > { %1413 = vmatprep.subr.bf16.mxu0 %v1703_v39  ;;  %v436_v51 = vsub.f32 %v1693_v32, %v2219_v44  ;;  %v2216_v53 = vand.u32 4294901760, %v1682_v25  ;;  %v2213_v54 = vand.u32 4294901760, %v1684_v26  ;;  %v1740_v58 = vsub.f32 %v159_v24, %v202_v34 }
  0x19   : > { %v430_v57 = vand.u32 4294901760, %v429_v47  ;;  %v318_v59 = vand.u32 4294901760, %v317_v48  ;;  %v325_v60 = vand.u32 4294901760, %v324_v49  ;;  %v1742_v62 = vpack.c.bf16 %v256_v52, %v253_v50 }
  0x1a   : > { %v437_v61 = vand.u32 4294901760, %v436_v51  ;;  %v1744_v63 = vsub.f32 %v176_v37, %v253_v50  ;;  %v443_v0 = vsub.f32 %v1682_v25, %v2216_v53  ;;  %v450_v2 = vsub.f32 %v1684_v26, %v2213_v54 }
  0x1b   : > { %1415 = vmatpush3.bf16.msra.mxu0 %v1714_v45  ;;  %v1438_v1 = vpack.c.bf16 %v325_v60, %v318_v59  ;;  %v205_v3 = vand.u32 4294901760, %v160_v55  ;;  %v208_v4 = vand.u32 4294901760, %v161_v56  ;;  %v2212_v9 = vand.u32 4294901760, %v1688_v28 }
  0x1c   : > { %v1436_v7 = vpack.c.bf16 %v437_v61, %v430_v57  ;;  %1417 = vmatprep.subr.bf16.mxu0 %v1742_v62  ;;  %v444_v8 = vand.u32 4294901760, %v443_v0  ;;  %v2209_v10 = vand.u32 4294901760, %v1701_v38  ;;  %v1765_v12 = vsub.f32 %v177_v42, %v256_v52  ;;  %v181_v57 = vld [vmem:[%s2199_s1 + $0xd8] sm:$0xff] }
  0x1d   : > { %v451_v13 = vand.u32 4294901760, %v450_v2  ;;  %v1767_v16 = vpack.c.bf16 %v208_v4, %v205_v3  ;;  %v1769_v17 = vsub.f32 %v160_v55, %v205_v3  ;;  %v331_v18 = vsub.f32 %v1688_v28, %v2212_v9 }
  0x1e   : > { %1437 = vmatprep.subr.bf16.mxu1 %v1436_v7  ;;  %v338_v19 = vsub.f32 %v1701_v38, %v2209_v10  ;;  %v259_v23 = vand.u32 4294901760, %v178_v5  ;;  %v262_v24 = vand.u32 4294901760, %v179_v6  ;;  %v2208_v33 = vand.u32 4294901760, %v1705_v40 }
  0x1f   : > { %1439 = vmatpush3.bf16.msra.mxu1 %v1438_v1  ;;  %v1440_v30 = vpack.c.bf16 %v451_v13, %v444_v8  ;;  %1419 = vmatpush3.bf16.msra.mxu0 %v1767_v16  ;;  %v2206_v34 = vand.u32 4294901760, %v1711_v43  ;;  %v211_v37 = vand.u32 4294901760, %v162_v11  ;;  %v1783_v42 = vsub.f32 %v161_v56, %v208_v4  ;;  %v180_v56 = vld [vmem:[%s2199_s1 + $0xd0] sm:$0xff] }
  0x20   : > { %v332_v47 = vand.u32 4294901760, %v331_v18  ;;  %v339_v48 = vand.u32 4294901760, %v338_v19  ;;  %v1785_v49 = vpack.c.bf16 %v262_v24, %v259_v23  ;;  %v1787_v50 = vsub.f32 %v178_v5, %v259_v23  ;;  %v164_v1 = vld [vmem:[%s2199_s1 + $0x50] sm:$0xff]  ;;  %v165_v18 = vld [vmem:[%s2199_s1 + $0x58] sm:$0xff] }
  0x21   : > { %1441 = vmatprep.subr.bf16.mxu1 %v1440_v30  ;;  %v457_v51 = vsub.f32 %v1705_v40, %v2208_v33  ;;  %v464_v52 = vsub.f32 %v1711_v43, %v2206_v34  ;;  %v214_v55 = vand.u32 4294901760, %v163_v29  ;;  %v1802_v60 = vsub.f32 %v179_v6, %v262_v24 }
  0x22   : > { %v1442_v59 = vpack.c.bf16 %v339_v48, %v332_v47  ;;  %1421 = vmatprep.subr.bf16.mxu0 %v1785_v49  ;;  %v2205_v61 = vand.u32 4294901760, %v1716_v46  ;;  %v2203_v0 = vand.u32 4294901760, %v1740_v58  ;;  %v1815_v5 = vsub.f32 %v162_v11, %v211_v37 }
  0x23   : > { %v458_v2 = vand.u32 4294901760, %v457_v51  ;;  %v465_v3 = vand.u32 4294901760, %v464_v52  ;;  %v1813_v4 = vpack.c.bf16 %v214_v55, %v211_v37  ;;  %v265_v8 = vand.u32 4294901760, %v180_v56 }
  0x24   : > { %1443 = vmatpush3.bf16.msra.mxu1 %v1442_v59  ;;  %v345_v6 = vsub.f32 %v1716_v46, %v2205_v61  ;;  %v352_v7 = vsub.f32 %v1740_v58, %v2203_v0  ;;  %v268_v13 = vand.u32 4294901760, %v181_v57  ;;  %v2202_v11 = vand.u32 4294901760, %v1744_v63 }
  0x25   : > { %v1444_v19 = vpack.c.bf16 %v465_v3, %v458_v2  ;;  %1423 = vmatpush3.bf16.msra.mxu0 %v1813_v4  ;;  %v2201_v23 = vand.u32 4294901760, %v1765_v12  ;;  %v217_v24 = vand.u32 4294901760, %v164_v1  ;;  %v1830_v30 = vsub.f32 %v163_v29, %v214_v55  ;;  %v182_v29 = vld [vmem:[%s2199_s1 + $0xe0] sm:$0xff]  ;;  %v183_v55 = vld [vmem:[%s2199_s1 + $0xe8] sm:$0xff] }
  0x26   : > { %v346_v37 = vand.u32 4294901760, %v345_v6  ;;  %v353_v47 = vand.u32 4294901760, %v352_v7  ;;  %v1832_v48 = vpack.c.bf16 %v268_v13, %v265_v8  ;;  %v1834_v51 = vsub.f32 %v180_v56, %v265_v8  ;;  %v166_v8 = vld [vmem:[%s2199_s1 + $0x60] sm:$0xff] }
  0x27   : > { %1445 = vmatprep.subr.bf16.mxu1 %v1444_v19  ;;  %v471_v52 = vsub.f32 %v1744_v63, %v2202_v11  ;;  %v478_v59 = vsub.f32 %v1765_v12, %v2201_v23  ;;  %v220_v2 = vand.u32 4294901760, %v165_v18  ;;  %v1849_v3 = vsub.f32 %v181_v57, %v268_v13 }
  0x28   : > { %2251 = vst [vmem:[#allocation2_spill] sm:$0xff] %v1832_v48  ;;  %v1446_v56 = vpack.c.bf16 %v353_v47, %v346_v37  ;;  %1425 = vmatprep.subr.bf16.mxu0 %v1832_v48  ;;  %v2204_v6 = vand.u32 4294901760, %v1769_v17  ;;  %v2207_v7 = vand.u32 4294901760, %v1783_v42  ;;  %v1858_v0 = vsub.f32 %v164_v1, %v217_v24 }
  0x29   : > { %v472_v19 = vand.u32 4294901760, %v471_v52  ;;  %v479_v23 = vand.u32 4294901760, %v478_v59  ;;  %v1856_v11 = vpack.c.bf16 %v220_v2, %v217_v24  ;;  %v271_v37 = vand.u32 4294901760, %v182_v29  ;;  %v167_v52 = vld [vmem:[%s2199_s1 + $0x68] sm:$0xff] }
  0x2a   : > { %1447 = vmatpush3.bf16.msra.mxu1 %v1446_v56  ;;  %v359_v57 = vsub.f32 %v1769_v17, %v2204_v6  ;;  %v366_v13 = vsub.f32 %v1783_v42, %v2207_v7  ;;  %v274_v47 = vand.u32 4294901760, %v183_v55  ;;  %v2211_v24 = vand.u32 4294901760, %v1787_v50 }
  0x2b   : > { %2252 = vst [vmem:[#allocation3_spill] sm:$0xff] %v1856_v11  ;;  %v1448_v1 = vpack.c.bf16 %v479_v23, %v472_v19  ;;  %1427 = vmatpush3.bf16.msra.mxu0 %v1856_v11  ;;  %v2210_v59 = vand.u32 4294901760, %v1802_v60  ;;  %v223_v56 = vand.u32 4294901760, %v166_v8  ;;  %v1877_v6 = vsub.f32 %v165_v18, %v220_v2  ;;  %v184_v18 = vld [vmem:[%s2199_s1 + $0xf0] sm:$0xff]  ;;  %v185_v2 = vld [vmem:[%s2199_s1 + $0xf8] sm:$0xff] }
  0x2c   : > { %v360_v61 = vand.u32 4294901760, %v359_v57  ;;  %v367_v34 = vand.u32 4294901760, %v366_v13  ;;  %v1879_v7 = vpack.c.bf16 %v274_v47, %v271_v37  ;;  %v1881_v33 = vsub.f32 %v182_v29, %v271_v37  ;;  %v153_v11 = vld [vmem:[%s1920_s26 + $0x18] sm:$0xff] }
  0x2d   : > { %1449 = vmatprep.subr.bf16.mxu1 %v1448_v1  ;;  %v485_v23 = vsub.f32 %v1787_v50, %v2211_v24  ;;  %v492_v19 = vsub.f32 %v1802_v60, %v2210_v59  ;;  %v226_v10 = vand.u32 4294901760, %v167_v52  ;;  %v1897_v57 = vsub.f32 %v183_v55, %v274_v47  ;;  %v168_v1 = vld [vmem:[%s2199_s1 + $0x70] sm:$0xff] }
  0x2e   : > { %2253 = vst [vmem:[#allocation4_spill] sm:$0xff] %v1879_v7  ;;  %v1450_v29 = vpack.c.bf16 %v367_v34, %v360_v61  ;;  %1429 = vmatprep.subr.bf16.mxu0 %v1879_v7  ;;  %v2215_v13 = vand.u32 4294901760, %v1815_v5  ;;  %v2214_v37 = vand.u32 4294901760, %v1830_v30  ;;  %v1906_v54 = vsub.f32 %v166_v8, %v223_v56 }
  0x2f   : > { %v486_v59 = vand.u32 4294901760, %v485_v23  ;;  %v493_v24 = vand.u32 4294901760, %v492_v19  ;;  %v1904_v9 = vpack.c.bf16 %v226_v10, %v223_v56  ;;  %v277_v55 = vand.u32 4294901760, %v184_v18  ;;  %v169_v23 = vld [vmem:[%s2199_s1 + $0x78] sm:$0xff] }
  0x30   : > { %1451 = vmatpush3.bf16.msra.mxu1 %v1450_v29  ;;  %v373_v34 = vsub.f32 %v1815_v5, %v2215_v13  ;;  %v380_v61 = vsub.f32 %v1830_v30, %v2214_v37  ;;  %v280_v47 = vand.u32 4294901760, %v185_v2  ;;  %v2223_v56 = vand.u32 4294901760, %v1834_v51 }
  0x31   : > { %2254 = vst [vmem:[#allocation5_spill] sm:$0xff] %v1904_v9  ;;  %v1452_v8 = vpack.c.bf16 %v493_v24, %v486_v59  ;;  %1431 = vmatpush3.bf16.msra.mxu0 %v1904_v9  ;;  %v2224_v19 = vand.u32 4294901760, %v1849_v3  ;;  %v229_v29 = vand.u32 4294901760, %v168_v1  ;;  %v1925_v37 = vsub.f32 %v167_v52, %v226_v10 }
  0x32   : > { %v374_v13 = vand.u32 4294901760, %v373_v34  ;;  %v381_v53 = vand.u32 4294901760, %v380_v61  ;;  %v1927_v36 = vpack.c.bf16 %v280_v47, %v277_v55  ;;  %v1929_v35 = vsub.f32 %v184_v18, %v277_v55  ;;  %v150_v34 = vld [vmem:[%s1920_s26] sm:$0xff] }
  0x33   : > { %1453 = vmatprep.subr.bf16.mxu1 %v1452_v8  ;;  %v499_v24 = vsub.f32 %v1834_v51, %v2223_v56  ;;  %v506_v59 = vsub.f32 %v1849_v3, %v2224_v19  ;;  %v232_v44 = vand.u32 4294901760, %v169_v23  ;;  %v1939_v10 = vsub.f32 %v185_v2, %v280_v47 }
  0x34   : > { %2255 = vst [vmem:[#allocation6_spill] sm:$0xff] %v1927_v36  ;;  %v1454_v9 = vpack.c.bf16 %v381_v53, %v374_v13  ;;  %1433 = vmatprep.subr.bf16.mxu0 %v1927_v36  ;;  %v2225_v52 = vand.u32 4294901760, %v1858_v0  ;;  %v2226_v18 = vand.u32 4294901760, %v1877_v6  ;;  %v1946_v56 = vsub.f32 %v168_v1, %v229_v29 }
  0x35   : > { %v500_v61 = vand.u32 4294901760, %v499_v24  ;;  %v507_v55 = vand.u32 4294901760, %v506_v59  ;;  %v1944_v8 = vpack.c.bf16 %v232_v44, %v229_v29  ;;  %v1954_v13 = vand.u32 4294901760, %v151_v41 }
  0x36   : > { %1455 = vmatpush3.bf16.msra.mxu1 %v1454_v9  ;;  %v387_v53 = vsub.f32 %v1858_v0, %v2225_v52  ;;  %v394_v2 = vsub.f32 %v1877_v6, %v2226_v18  ;;  %v2229_v47 = vand.u32 4294901760, %v1881_v33  ;;  %v2235_v24 = vand.u32 4294901760, %v1897_v57 }
  0x37   : > { %2256 = vst [vmem:[#allocation7_spill] sm:$0xff] %v1944_v8  ;;  %2257 = vst [vmem:[#allocation8_spill] sm:$0xff] %v1954_v13  ;;  %v1456_v19 = vpack.c.bf16 %v507_v55, %v500_v61  ;;  %1435 = vmatpush3.bf16.msra.mxu0 %v1944_v8  ;;  %v1468_v9 = vpack.c.bf16 %v1693_v32, %v1691_v31  ;;  %v1961_v1 = vand.u32 4294901760, %v150_v34  ;;  %538 = vmatprep.mubr.f32.mxu1 %v1954_v13 }
  0x38   : > { %v388_v29 = vand.u32 4294901760, %v387_v53  ;;  %v395_v59 = vand.u32 4294901760, %v394_v2  ;;  %v1964_v52 = vsub.f32 %v151_v41, %v1954_v13  ;;  %v513_v18 = vsub.f32 %v1881_v33, %v2229_v47 }
  0x39   : > { %1457 = vmatprep.subr.bf16.mxu1 %v1456_v19  ;;  %v520_v61 = vsub.f32 %v1897_v57, %v2235_v24  ;;  %1469 = vmatprep.subr.bf16.mxu0 %v1468_v9  ;;  %v1974_v55 = vsub.f32 %v150_v34, %v1961_v1  ;;  %v2234_v53 = vand.u32 4294901760, %v1906_v54  ;;  %v2236_v41 = vand.u32 4294901760, %v1925_v37 }
  0x3a   : > { %v1978_v2 = vsub.f32 %v169_v23, %v232_v44  ;;  %v1458_v8 = vpack.c.bf16 %v395_v59, %v388_v29  ;;  %v2237_v47 = vand.u32 4294901760, %v1964_v52  ;;  %v514_v36 = vand.u32 4294901760, %v513_v18 }
  0x3b   : > { %2258 = vst [vmem:[#allocation9_spill] sm:$0xff] %v1974_v55  ;;  %v521_v13 = vand.u32 4294901760, %v520_v61  ;;  %v2242_v19 = vand.u32 4294901760, %v1974_v55  ;;  %v401_v9 = vsub.f32 %v1906_v54, %v2234_v53  ;;  %v408_v34 = vsub.f32 %v1925_v37, %v2236_v41 }
  0x3c   : > { %1459 = vmatpush3.bf16.msra.mxu1 %v1458_v8  ;;  %v285_v44 = vsub.f32 %v1964_v52, %v2237_v47  ;;  %v1470_v23 = vpack.c.bf16 %v1671_v21, %v1661_v15  ;;  %v2243_v18 = vand.u32 4294901760, %v1929_v35  ;;  %v2244_v29 = vand.u32 4294901760, %v1939_v10 }
  0x3d   : > { %v1460_v59 = vpack.c.bf16 %v521_v13, %v514_v36  ;;  %v291_v61 = vsub.f32 %v1974_v55, %v2242_v19  ;;  %v402_v53 = vand.u32 4294901760, %v401_v9  ;;  %v409_v24 = vand.u32 4294901760, %v408_v34 }
  0x3e   : > { %v286_v41 = vand.u32 4294901760, %v285_v44  ;;  %v527_v8 = vsub.f32 %v1929_v35, %v2243_v18  ;;  %v534_v47 = vsub.f32 %v1939_v10, %v2244_v29  ;;  %v2246_v7 = vand.u32 4294901760, %v1946_v56 }
  0x3f   : > { %1461 = vmatprep.subr.bf16.mxu1 %v1460_v59  ;;  %v292_v36 = vand.u32 4294901760, %v291_v61  ;;  %v1462_v13 = vpack.c.bf16 %v409_v24, %v402_v53  ;;  %v1472_v9 = vpack.c.bf16 %v1684_v26, %v1682_v25  ;;  %v2245_v34 = vand.u32 4294901760, %v1978_v2  ;;  %v152_v24 = vld [vmem:[%s1920_s26 + $0x10] sm:$0xff] }
  0x40   : > { %287 = vmatprep.mubr.f32.mxu0 %v286_v41  ;;  %v528_v44 = vand.u32 4294901760, %v527_v8  ;;  %v535_v19 = vand.u32 4294901760, %v534_v47  ;;  %v415_v18 = vsub.f32 %v1946_v56, %v2246_v7  ;;  %v2015_v61 = vand.u32 4294901760, %v153_v11 }
  0x41   : > { %293 = vmatmul.mubr.f32.vlgmr.msra.gmra.mrb[0].mxu0 %v292_v36  ;;  %1463 = vmatpush3.bf16.msra.mxu1 %v1462_v13  ;;  %v422_v59 = vsub.f32 %v1978_v2, %v2245_v34  ;;  %v1474_v41 = vpack.c.bf16 %v1701_v38, %v1688_v28  ;;  %v1476_v8 = vpack.c.bf16 %v1711_v43, %v1705_v40  ;;  %v2025_v13 = vand.u32 4294901760, %v152_v24 }
  0x42   : > { %1471 = vmatpush3.bf16.msra.mxu0 %v1470_v23  ;;  %v1464_v53 = vpack.c.bf16 %v535_v19, %v528_v44  ;;  %v416_v29 = vand.u32 4294901760, %v415_v18  ;;  %v2023_v36 = vsub.f32 %v153_v11, %v2015_v61  ;;  %v1478_v23 = vpack.c.bf16 %v1740_v58, %v1716_v46 }
  0x43   : > { %1473 = vmatprep.subr.bf16.mxu0 %v1472_v9  ;;  %v423_v47 = vand.u32 4294901760, %v422_v59  ;;  %v1480_v19 = vpack.c.bf16 %v1765_v12, %v1744_v63  ;;  %v2259_v18 = vand.u32 4294901760, %v1691_v31  ;;  %v2260_v9 = vand.u32 4294901760, %v1693_v32 }
  0x44   : > { %1465 = vmatprep.subr.bf16.mxu1 %v1464_v53  ;;  %v299_v59 = vand.u32 4294901760, %v2023_v36  ;;  %v2037_v11 = vsub.f32 %v152_v24, %v2025_v13  ;;  %v2261_v53 = vand.u32 4294901760, %v1661_v15  ;;  %v2263_v7 = vand.u32 4294901760, %v1682_v25 }
  0x45   : > { %v1466_v34 = vpack.c.bf16 %v423_v47, %v416_v29  ;;  %v1532_v44 = vpack.c.bf16 %v2260_v9, %v2259_v18  ;;  %v2262_v29 = vand.u32 4294901760, %v1671_v21  ;;  %v2264_v55 = vand.u32 4294901760, %v1684_v26 }
  0x46   : > { %1475 = vmatpush3.bf16.msra.mxu0 %v1474_v41  ;;  %v2265_v31 = vand.u32 4294901760, %v1688_v28  ;;  %v2266_v32 = vand.u32 4294901760, %v1701_v38  ;;  %v2267_v24 = vand.u32 4294901760, %v1705_v40  ;;  %v2268_v18 = vand.u32 4294901760, %v1711_v43 }
  0x47   : > { %v1534_v47 = vpack.c.bf16 %v2262_v29, %v2261_v53  ;;  %v1536_v48 = vpack.c.bf16 %v2264_v55, %v2263_v7  ;;  %1467 = vmatpush3.bf16.msra.mxu1 %v1466_v34  ;;  %1477 = vmatprep.subr.bf16.mxu0 %v1476_v8  ;;  %v2269_v21 = vand.u32 4294901760, %v1716_v46  ;;  %v2270_v9 = vand.u32 4294901760, %v1740_v58 }
  0x48   : > { %v1538_v41 = vpack.c.bf16 %v2266_v32, %v2265_v31  ;;  %v1540_v15 = vpack.c.bf16 %v2268_v18, %v2267_v24  ;;  %1501 = vmatprep.subr.bf16.mxu1 %v1659_v14  ;;  %v300_v26 = vsub.f32 %v2023_v36, %v299_v59  ;;  %v305_v28 = vand.u32 4294901760, %v2037_v11 }
  0x49   : > { %v2059_v25 = vpack.c.bf16 %v2270_v9, %v2269_v21  ;;  %v2271_v38 = vand.u32 4294901760, %v1744_v63  ;;  %v2272_v40 = vand.u32 4294901760, %v1765_v12  ;;  %v2273_v7 = vand.u32 4294901760, %v1769_v17  ;;  %v2281_v21 = vld [vmem:[#allocation3_spill] sm:$0xff]  ;;  %v2282_v9 = vld [vmem:[#allocation4_spill] sm:$0xff] }
  0x4a   : > { %v2274_v46 = vand.u32 4294901760, %v1783_v42  ;;  %v2275_v55 = vand.u32 4294901760, %v1787_v50  ;;  %v2276_v34 = vand.u32 4294901760, %v1802_v60  ;;  %v2277_v53 = vand.u32 4294901760, %v1815_v5  ;;  %540 = vmatmul.mubr.f32.vlgmr.msra.gmra.mrb[0].mxu1 %v1961_v1  ;;  %1479 = vmatpush3.bf16.msra.mxu0 %v1478_v23 }
  0x4b   : > { %v1544_v43 = vpack.c.bf16 %v2272_v40, %v2271_v38  ;;  %v2278_v29 = vand.u32 4294901760, %v1830_v30  ;;  %v1482_v12 = vpack.c.bf16 %v1783_v42, %v1769_v17  ;;  %v301_v31 = vand.u32 4294901760, %v300_v26  ;;  %1503 = vmatpush3.bf16.msra.mxu1 %v1669_v20  ;;  %1481 = vmatprep.subr.bf16.mxu0 %v1480_v19  ;;  %v2280_v19 = vld [vmem:[#allocation2_spill] sm:$0xff]  ;;  %v2283_v26 = vld [vmem:[#allocation9_spill] sm:$0xff] }
  0x4c   : > { %v2074_v58 = vpack.c.bf16 %v2274_v46, %v2273_v7  ;;  %v2080_v8 = vpack.c.bf16 %v2276_v34, %v2275_v55  ;;  %v306_v32 = vsub.f32 %v2037_v11, %v305_v28  ;;  %v1484_v24 = vpack.c.bf16 %v1802_v60, %v1787_v50  ;;  %1505 = vmatprep.subr.bf16.mxu1 %v1673_v22  ;;  %v2284_v38 = vld [vmem:[#allocation5_spill] sm:$0xff]  ;;  %v2285_v40 = vld [vmem:[#allocation6_spill] sm:$0xff]  ;;  %v2286_v7 = vld [vmem:[#allocation8_spill] sm:$0xff] }
  0x4d   : > { %v2086_v63 = vpack.c.bf16 %v2278_v29, %v2277_v53  ;;  %302 = vmatprep.mubr.f32.mxu0 %v301_v31  ;;  %545 = vmatprep.mubr.f32.mxu1 %v2015_v61  ;;  %v1486_v17 = vpack.c.bf16 %v1830_v30, %v1815_v5  ;;  %v1488_v42 = vpack.c.bf16 %v1849_v3, %v1834_v51  ;;  %v2279_v50 = vand.u32 4294901760, %v1964_v52  ;;  %v2287_v46 = vld [vmem:[#allocation7_spill] sm:$0xff] }
  0x4e   : > { %v307_v18 = vand.u32 4294901760, %v306_v32  ;;  %1483 = vmatpush3.bf16.msra.mxu0 %v1482_v12  ;;  %547 = vmatmul.mubr.f32.gmra.mrb[2].mxu1 %v2025_v13  ;;  %v1490_v60 = vpack.c.bf16 %v1877_v6, %v1858_v0  ;;  %v1492_v5 = vpack.c.bf16 %v1897_v57, %v1881_v33  ;;  %v1494_v30 = vpack.c.bf16 %v1925_v37, %v1906_v54 }
  0x4f   : > { %1507 = vmatpush3.bf16.msra.mxu1 %v1686_v27  ;;  %1485 = vmatprep.subr.bf16.mxu0 %v1484_v24  ;;  %v1498_v23 = vpack.c.bf16 %v1978_v2, %v1946_v56 }
  0x50   : > { %1509 = vmatprep.subr.bf16.mxu1 %v1703_v39  ;;  %308 = vmatmul.mubr.f32.gmra.mrb[2].mxu0 %v307_v18 }
  0x51   : > { %682 = vmatprep.mubr.f32.mxu0 %v1964_v52  ;;  %798 = vmatprep.mubr.f32.mxu1 %v2279_v50  ;;  %v1496_v52 = vpack.c.bf16 %v1939_v10, %v1929_v35 }
  0x52   : > { %1487 = vmatpush3.bf16.msra.mxu0 %v1486_v17 }
  0x53   : > { %1511 = vmatpush3.bf16.msra.mxu1 %v1714_v45  ;;  %1489 = vmatprep.subr.bf16.mxu0 %v1488_v42 }
  0x54   : > { %1513 = vmatprep.subr.bf16.mxu1 %v1742_v62 }
  0x56   : > { %1491 = vmatpush3.bf16.msra.mxu0 %v1490_v60 }
  0x57   : > { %1515 = vmatpush3.bf16.msra.mxu1 %v1767_v16  ;;  %1493 = vmatprep.subr.bf16.mxu0 %v1492_v5 }
  0x58   : > { %1517 = vmatprep.subr.bf16.mxu1 %v1785_v49 }
  0x5a   : > { %1495 = vmatpush3.bf16.msra.mxu0 %v1494_v30 }
  0x5b   : > { %1519 = vmatpush3.bf16.msra.mxu1 %v1813_v4  ;;  %1497 = vmatprep.subr.bf16.mxu0 %v1496_v52 }
  0x5c   : > { %1521 = vmatprep.subr.bf16.mxu1 %v2280_v19 }
  0x5e   : > { %1499 = vmatpush3.bf16.msra.mxu0 %v1498_v23 }
  0x5f   : > { %1523 = vmatpush3.bf16.msra.mxu1 %v2281_v21  ;;  %1533 = vmatprep.subr.bf16.mxu0 %v1532_v44  ;;  %v2288_v44 = vand.u32 4294901760, %v2283_v26 }
  0x60   : > { %1525 = vmatprep.subr.bf16.mxu1 %v2282_v9 }
  0x61   : > { %685 = vmatmul.mubr.f32.vlgmr.msra.gmra.mrb[4].mxu0 %v2283_v26 }
  0x62   : > { %1535 = vmatpush3.bf16.msra.mxu0 %v1534_v47  ;;  %691 = vmatprep.mubr.f32.mxu0 %v2023_v36  ;;  %v2292_v36 = vand.u32 4294901760, %v1877_v6 }
  0x63   : > { %1527 = vmatpush3.bf16.msra.mxu1 %v2284_v38  ;;  %1537 = vmatprep.subr.bf16.mxu0 %v1536_v48  ;;  %v2290_v48 = vand.u32 4294901760, %v1849_v3 }
  0x64   : > { %1529 = vmatprep.subr.bf16.mxu1 %v2285_v40 }
  0x65   : > { %694 = vmatmul.mubr.f32.gmra.mrb[6].mxu0 %v2037_v11  ;;  %v2296_v11 = vand.u32 4294901760, %v1925_v37 }
  0x66   : > { %1539 = vmatpush3.bf16.msra.mxu0 %v1538_v41  ;;  %979 = vmatprep.mubr.f32.mxu0 %v2286_v7 }
  0x67   : > { %1531 = vmatpush3.bf16.msra.mxu1 %v2287_v46  ;;  %1541 = vmatprep.subr.bf16.mxu0 %v1540_v15 }
  0x68   : > { %1565 = vmatprep.subr.bf16.mxu1 %v1659_v14  ;;  %v2289_v14 = vand.u32 4294901760, %v1834_v51  ;;  %v2294_v51 = vand.u32 4294901760, %v1897_v57 }
  0x6a   : > { %802 = vmatmul.mubr.f32.vlgmr.msra.gmra.mrb[4].mxu1 %v2288_v44  ;;  %1543 = vmatpush3.bf16.msra.mxu0 %v2059_v25 }
  0x6b   : > { %1567 = vmatpush3.bf16.msra.mxu1 %v1669_v20  ;;  %809 = vmatprep.mubr.f32.mxu1 %v299_v59  ;;  %v1552_v20 = vpack.c.bf16 %v2290_v48, %v2289_v14 }
  0x6c   : > { %1545 = vmatprep.subr.bf16.mxu0 %v1544_v43  ;;  %1569 = vmatprep.subr.bf16.mxu1 %v1673_v22  ;;  %v2291_v22 = vand.u32 4294901760, %v1858_v0  ;;  %v2297_v0 = vand.u32 4294901760, %v1929_v35 }
  0x6e   : > { %813 = vmatmul.mubr.f32.gmra.mrb[6].mxu1 %v305_v28  ;;  %1547 = vmatpush3.bf16.msra.mxu0 %v2074_v58  ;;  %v1554_v59 = vpack.c.bf16 %v2292_v36, %v2291_v22 }
  0x6f   : > { %1571 = vmatpush3.bf16.msra.mxu1 %v1686_v27  ;;  %1549 = vmatprep.subr.bf16.mxu0 %v2080_v8  ;;  %v2293_v27 = vand.u32 4294901760, %v1881_v33  ;;  %v2299_v33 = vand.u32 4294901760, %v1946_v56 }
  0x70   : > { %1573 = vmatprep.subr.bf16.mxu1 %v1703_v39  ;;  %1090 = vmatprep.mubr.f32.mxu1 %v2286_v7  ;;  %v2295_v39 = vand.u32 4294901760, %v1906_v54 }
  0x71   : > { %v1556_v3 = vpack.c.bf16 %v2294_v51, %v2293_v27 }
  0x72   : > { %1551 = vmatpush3.bf16.msra.mxu0 %v2086_v63  ;;  %v1558_v47 = vpack.c.bf16 %v2296_v11, %v2295_v39 }
  0x73   : > { %1575 = vmatpush3.bf16.msra.mxu1 %v1714_v45  ;;  %1553 = vmatprep.subr.bf16.mxu0 %v1552_v20  ;;  %v2298_v45 = vand.u32 4294901760, %v1939_v10 }
  0x74   : > { %1577 = vmatprep.subr.bf16.mxu1 %v1742_v62  ;;  %v2300_v62 = vand.u32 4294901760, %v1978_v2 }
  0x75   : > { %v1560_v6 = vpack.c.bf16 %v2298_v45, %v2297_v0 }
  0x76   : > { %1555 = vmatpush3.bf16.msra.mxu0 %v1554_v59  ;;  %v1562_v57 = vpack.c.bf16 %v2300_v62, %v2299_v33 }
  0x77   : > { %1579 = vmatpush3.bf16.msra.mxu1 %v1767_v16  ;;  %1557 = vmatprep.subr.bf16.mxu0 %v1556_v3 }
  0x78   : > { %1581 = vmatprep.subr.bf16.mxu1 %v1785_v49 }
  0x7a   : > { %1559 = vmatpush3.bf16.msra.mxu0 %v1558_v47 }
  0x7b   : > { %1583 = vmatpush3.bf16.msra.mxu1 %v1813_v4  ;;  %1561 = vmatprep.subr.bf16.mxu0 %v1560_v6 }
  0x7c   : > { %1585 = vmatprep.subr.bf16.mxu1 %v2280_v19 }
  0x7e   : > { %1563 = vmatpush3.bf16.msra.mxu0 %v1562_v57 }
  0x7f   : > { %1587 = vmatpush3.bf16.msra.mxu1 %v2281_v21 }
  0x80   : > { %1589 = vmatprep.subr.bf16.mxu1 %v2282_v9 }
  0x81   : > { %981 = vmatmul.mubr.f32.vlgmr.msra.gmra.mrb[8].mxu0 %v1961_v1 }
  0x82   : > { %986 = vmatprep.mubr.f32.mxu0 %v2015_v61 }
  0x83   : > { %1591 = vmatpush3.bf16.msra.mxu1 %v2284_v38 }
  0x84   : > { %1593 = vmatprep.subr.bf16.mxu1 %v2285_v40 }
  0x85   : > { %988 = vmatmul.mubr.f32.gmra.mrb[10].mxu0 %v2025_v13 }
  0x87   : > { %1595 = vmatpush3.bf16.msra.mxu1 %v2287_v46 }
  0x8a   : > { %1092 = vmatmul.mubr.f32.vlgmr.msra.gmra.mrb[8].mxu1 %v1961_v1 }
  0x8b   : > { %1097 = vmatprep.mubr.f32.mxu1 %v2015_v61 }
  0x8e   : > { %1099 = vmatmul.mubr.f32.gmra.mrb[10].mxu1 %v2025_v13 }
 0x114   : > { %v1208_v35 = vpop.f32.mrb[0].mxu0 }
 0x115   : > { %v1209_v54 = vpop.f32.mrb[1].mxu0 }
 0x116   : > { %v1210_v16 = vadd.f32 %v1209_v54, %v1208_v35 }
 0x11d   : > { %v1246_v49 = vpop.f32.mrb[0].mxu1 }
 0x11e   : > { %v1247_v4 = vpop.f32.mrb[1].mxu1 }
 0x11f   : > { %v1248_v37 = vadd.f32 %v1247_v4, %v1246_v49 }
 0x121   : > { %v542_v56 = vadd.f32 %v1248_v37, %v1210_v16  ;;  %v1249_v10 = vpop.f32.mrb[2].mxu1 }
 0x122   : > { %v1250_v2 = vpop.f32.mrb[3].mxu1 }
 0x123   : > { %v1211_v41 = vpop.f32.mrb[2].mxu0  ;;  %v1251_v15 = vadd.f32 %v1250_v2, %v1249_v10 }
 0x124   : > { %v1212_v25 = vpop.f32.mrb[3].mxu0 }
 0x125   : > { %v1213_v28 = vadd.f32 %v1212_v25, %v1211_v41 }
 0x127   : > { %v549_v43 = vadd.f32 %v1251_v15, %v1213_v28 }
 0x134   : > { %v1284_v58 = vpop.f32.mrb[4].mxu0 }
 0x135   : > { %v1285_v1 = vpop.f32.mrb[5].mxu0 }
 0x136   : > { %v1286_v55 = vadd.f32 %v1285_v1, %v1284_v58 }
 0x138   : > { %v687_v61 = vadd.f32 %v1286_v55, %v542_v56  ;;  %v1287_v34 = vpop.f32.mrb[6].mxu0 }
 0x139   : > { %v1288_v13 = vpop.f32.mrb[7].mxu0 }
 0x13a   : > { %v1289_v8 = vadd.f32 %v1288_v13, %v1287_v34 }
 0x13c   : > { %v696_v53 = vadd.f32 %v1289_v8, %v549_v43 }
 0x13d   : > { %v1322_v29 = vpop.f32.mrb[4].mxu1 }
 0x13e   : > { %v1323_v63 = vpop.f32.mrb[5].mxu1 }
 0x13f   : > { %v1324_v12 = vadd.f32 %v1323_v63, %v1322_v29 }
 0x141   : > { %v804_v31 = vadd.f32 %v1324_v12, %v687_v61  ;;  %v1325_v32 = vpop.f32.mrb[6].mxu1 }
 0x142   : > { %v1326_v24 = vpop.f32.mrb[7].mxu1 }
 0x143   : > { %v1327_v18 = vadd.f32 %v1326_v24, %v1325_v32 }
 0x145   : > { %v815_v17 = vadd.f32 %v1327_v18, %v696_v53 }
 0x154   : > { %v1360_v42 = vpop.f32.mrb[8].mxu0 }
 0x155   : > { %v1361_v50 = vpop.f32.mrb[9].mxu0 }
 0x156   : > { %v1362_v60 = vadd.f32 %v1361_v50, %v1360_v42 }
 0x158   : > { %v983_v5 = vadd.f32 %v1362_v60, %v804_v31  ;;  %v1363_v30 = vpop.f32.mrb[10].mxu0 }
 0x159   : > { %v1364_v52 = vpop.f32.mrb[11].mxu0 }
 0x15a   : > { %v1365_v23 = vadd.f32 %v1364_v52, %v1363_v30 }
 0x15c   : > { %v990_v19 = vadd.f32 %v1365_v23, %v815_v17 }
 0x15d   : > { %v1398_v21 = vpop.f32.mrb[8].mxu1 }
 0x15e   : > { %v1399_v9 = vpop.f32.mrb[9].mxu1 }
 0x15f   : > { %v1400_v26 = vadd.f32 %v1399_v9, %v1398_v21 }
 0x161   : > { %v1094_v38 = vadd.f32 %v1400_v26, %v983_v5  ;;  %v1401_v40 = vpop.f32.mrb[10].mxu1 }
 0x162   : > { %v1402_v7 = vpop.f32.mrb[11].mxu1 }
 0x163   : > { %1105 = vst.msk [vmem:[%s148_s30] sm:$0xff] %vm1104_vm0, %v1094_v38  ;;  %v1403_v46 = vadd.f32 %v1402_v7, %v1401_v40 }
 0x165   : > { %v1101_v44 = vadd.f32 %v1403_v46, %v990_v19 }
 0x167   : > { %1106 = vst.msk [vmem:[%s148_s30 + $0x8] sm:$0xff] %vm1104_vm0, %v1101_v44 }
 0x168 PF: > { %s12_s9 = sadd.s32 1, %s1610_s9  }
 0x169   : > { %p9_p4 = scmp.ge.s32.totalorder %s12_s9, 4  }
 0x16b   :  { %11 = sbr.rel (!%p9_p4) target bundleno = 1 (0x1), region = 58 }

</bundles_post_ra>
